<compile_context>
chip_gen: v7x
topology: tpu7x:2x2x1
jax: 0.10.0
libtpu: 0.0.40
codegen_flags: <defaults>
</compile_context>

<pallas_src>
import functools

import jax
import jax.numpy as jnp
from jax.experimental import pallas as pl
from jax.experimental.pallas import tpu as pltpu


# ----------------------------- Pallas kernel --------------------------------
def _make_maxsim_kernel(Ld, Lk):
    """Kernel closure over static doc length / doc tile size."""

    def kernel(q_ref, d_ref, bias_ref, o_ref, m_ref):
        # q_ref   : (Bt, Lq, D)   bf16, L2-normalized, padded query rows zeroed
        # d_ref   : (Bt, Lk, D)   bf16, L2-normalized
        # bias_ref: (Bt, 1, Lk)   f32 additive doc mask (0 real / -1e9 pad)
        # o_ref   : (Bt, 128)     per-element score broadcast across lanes
        # m_ref   : (Bt, Lq, 1)   f32 running max-sim accumulator (VMEM scratch)
        k = pl.program_id(1)

        @pl.when(k == 0)
        def _init():
            m_ref[...] = jnp.full(m_ref.shape, -jnp.inf, dtype=m_ref.dtype)

        # Batched cosine-similarity interaction on the MXU: bf16 operands read
        # directly from the refs, f32 accumulation, contraction over the last
        # (lane) dim of both operands (no materialized transpose).
        sim = jnp.einsum(
            "bqd,bkd->bqk",
            q_ref[...],
            d_ref[...],
            preferred_element_type=jnp.float32,
        )                                             # (Bt, Lq, Lk) f32
        sim = sim + bias_ref[...]                     # mask padded doc tokens

        if Ld % Lk != 0:
            # Partial last Ld tile: OOB columns hold garbage d rows / bias;
            # force them to -1e9 so they never win the max.
            col = jax.lax.broadcasted_iota(jnp.int32, (1, 1, Lk), 2) + k * Lk
            sim = jnp.where(col < Ld, sim, jnp.float32(-1e9))

        m_ref[...] = jnp.maximum(
            m_ref[...], jnp.max(sim, axis=-1, keepdims=True))

        @pl.when(k == pl.num_programs(1) - 1)
        def _finalize():
            score = jnp.sum(m_ref[...], axis=1)       # (Bt, 1)
            # Zeroed (padded) query rows contribute exactly 0 since real doc
            # positions carry bias 0, so no explicit query-mask multiply here.
            o_ref[...] = jnp.broadcast_to(score, o_ref.shape)

    return kernel


@functools.partial(jax.jit, static_argnames=("block_b", "block_ld"))
def maxsim_score(q_emb, d_emb, q_mask, d_mask, *, block_b=32, block_ld=512):
    """Per-(query, document) max-sim relevance score via a Pallas kernel."""
    assert block_b % 8 == 0, "block_b must be a multiple of 8 (sublanes)"
    assert block_ld % 128 == 0, "block_ld must be a multiple of 128 (lanes)"

    B, Lq, D = q_emb.shape
    _, Ld, _ = d_emb.shape

    # L2-normalize outside the kernel (fuses with the embedding gather in XLA,
    # avoids large f32 temporaries / convert passes in VMEM); fold the query
    # padding mask into q (padded query rows become zero vectors and stay zero
    # after the eps-regularized normalization).
    eps = jnp.float32(1e-6)
    qf = q_emb.astype(jnp.float32) * q_mask.astype(jnp.float32)[..., None]
    qn = (qf * jax.lax.rsqrt(jnp.sum(qf * qf, -1, keepdims=True) + eps)
          ).astype(jnp.bfloat16)
    df = d_emb.astype(jnp.float32)
    dn = (df * jax.lax.rsqrt(jnp.sum(df * df, -1, keepdims=True) + eps)
          ).astype(jnp.bfloat16)
    # Document mask travels as a tiny additive-bias stream (0 real / -1e9 pad).
    bias = jnp.where(d_mask, 0.0, -1e9).astype(jnp.float32)[:, None, :]

    # Tile sizes: no padding anywhere — block dims that are not (8,128)
    # aligned are set equal to the full array dim (allowed by BlockSpec).
    Bt = block_b if B >= block_b else B          # == B (full dim) when B small
    Lk = block_ld if Ld > block_ld else Ld       # == Ld (full dim) when short
    nb = pl.cdiv(B, Bt)
    nk = pl.cdiv(Ld, Lk)

    # Advisory cost estimate so XLA schedules the embedding gathers / norm
    # around the kernel sensibly.
    cost = pl.CostEstimate(
        flops=2 * B * Lq * Ld * D,
        transcendentals=0,
        bytes_accessed=(B * Lq * D * 2 + B * Ld * D * 2
                        + B * Ld * 4 + B * 128 * 4),
    )

    # Explicit VMEM budget: double-buffered input/output blocks + scratch +
    # on-chip sim temporaries, clamped for v7x's 64 MiB physical VMEM.
    blk_bytes = Bt * Lq * D * 2 + Bt * Lk * D * 2 + Bt * Lk * 4 + Bt * 128 * 4
    vmem_est = 2 * blk_bytes + Bt * Lq * 4 + 2 * Bt * Lq * Lk * 4 + (2 << 20)
    vmem_limit = int(min(48 << 20, max(16 << 20, vmem_est)))

    out = pl.pallas_call(
        _make_maxsim_kernel(Ld, Lk),
        out_shape=jax.ShapeDtypeStruct((B, 128), jnp.float32),
        grid_spec=pltpu.PrefetchScalarGridSpec(
            num_scalar_prefetch=0,
            grid=(nb, nk),
            in_specs=[
                pl.BlockSpec((Bt, Lq, D), lambda b, k: (b, 0, 0)),
                pl.BlockSpec((Bt, Lk, D), lambda b, k: (b, k, 0)),
                pl.BlockSpec((Bt, 1, Lk), lambda b, k: (b, 0, k)),
            ],
            out_specs=pl.BlockSpec((Bt, 128), lambda b, k: (b, 0)),
            scratch_shapes=[pltpu.VMEM((Bt, Lq, 1), jnp.float32)],
        ),
        compiler_params=pltpu.CompilerParams(
            dimension_semantics=("parallel", "arbitrary"),
            vmem_limit_bytes=vmem_limit,
        ),
        cost_estimate=cost,
    )(qn, dn, bias)
    return out[:, 0]  # (B,)


# ----------------------------- Synthetic modules -----------------------------
class WordEmbedder:
    """Stands in for the AllenNLP TextFieldEmbedder: simple bf16 table lookup."""

    def __init__(self, table):
        self.table = table.astype(jnp.bfloat16)  # (vocab, D), bf16 in HBM

    def embed(self, ids):
        return jnp.take(self.table, ids, axis=0)  # (B, L, D) bf16


class MaxSimNeuralIRModel:
    """Synthetic neural IR model; forward matches the call signature
    `forward(word_embeddings, query, document, output_secondary_output)`."""

    def forward(self, word_embeddings, query, document, output_secondary_output=False):
        q_ids = query["tokens"]
        d_ids = document["tokens"]
        q_emb = word_embeddings.embed(q_ids)
        d_emb = word_embeddings.embed(d_ids)
        q_mask = q_ids > 0   # id 0 == padding
        d_mask = d_ids > 0
        score = maxsim_score(q_emb, d_emb, q_mask, d_mask)
        if output_secondary_output:
            return score, {"query_mask": q_mask, "document_mask": d_mask}
        return score

    def forward_representation(self, word_embeddings, sequence, sequence_type=None):
        ids = sequence["tokens"]
        return word_embeddings.embed(ids)


class NeuralIREncoderPassThrough:
    """JAX/Pallas port of matchmaker's NeuralIR_Encoder_PassThrough (pure delegation)."""

    def __init__(self, word_embeddings, neural_ir_model):
        self.word_embeddings = word_embeddings
        self.neural_ir_model = neural_ir_model

    def forward(self, query, document, title=None, output_secondary_output=False):
        if title is None:
            return self.neural_ir_model.forward(
                self.word_embeddings, query, document, output_secondary_output)
        # TODO(synk): title-aware neural IR models are not instantiated here;
        # the delegation shape is preserved but only the title-is-None path is exercised.
        return self.neural_ir_model.forward(
            self.word_embeddings, query, document, title, output_secondary_output)

    def forward_representation(self, sequence, title=None, sequence_type=None):
        if title is None:
            return self.neural_ir_model.forward_representation(
                self.word_embeddings, sequence, sequence_type)
        return self.neural_ir_model.forward_representation(
            self.word_embeddings, sequence, title, sequence_type)


# ----------------------------------- main ------------------------------------
if __name__ == "__main__":
    key = jax.random.PRNGKey(0)
    vocab, D = 100, 32
    B, Lq, Ld = 2, 8, 16

    k1, k2, k3 = jax.random.split(key, 3)
    emb_table = 0.1 * jax.random.normal(k1, (vocab, D), jnp.float32)
    # non-pad ids drawn from [1, vocab) so every query/doc has real tokens
    q_ids = jax.random.randint(k2, (B, Lq), 1, vocab, dtype=jnp.int32)
    d_ids = jax.random.randint(k3, (B, Ld), 1, vocab, dtype=jnp.int32)
    # deterministic padding tail (id 0 == pad)
    q_ids = q_ids.at[:, -2:].set(0)
    d_ids = d_ids.at[:, -4:].set(0)

    encoder = NeuralIREncoderPassThrough(WordEmbedder(emb_table), MaxSimNeuralIRModel())

    query = {"tokens": q_ids}
    document = {"tokens": d_ids}

    scores = encoder.forward(query, document)          # (B,) float32
    scores = jax.block_until_ready(scores)

    # sanity check against a pure-JAX reference (same bf16 table, f32 math)
    def _ref(q_ids, d_ids):
        tbl = emb_table.astype(jnp.bfloat16).astype(jnp.float32)
        q = jnp.take(tbl, q_ids, axis=0)
        d = jnp.take(tbl, d_ids, axis=0)
        qn = q * jax.lax.rsqrt(jnp.sum(q * q, -1, keepdims=True) + 1e-6)
        dn = d * jax.lax.rsqrt(jnp.sum(d * d, -1, keepdims=True) + 1e-6)
        sim = jnp.einsum("bqd,bkd->bqk", qn, dn)
        sim = jnp.where((d_ids > 0)[:, None, :], sim, -1e9)
        ms = jnp.max(sim, axis=-1)
        return jnp.sum(ms * (q_ids > 0).astype(jnp.float32), axis=-1)

    ref = jax.block_until_ready(_ref(q_ids, d_ids))
    # bf16 MXU operands => loosened tolerance vs. the f32 reference
    assert jnp.allclose(scores, ref, atol=5e-2, rtol=5e-2), (scores, ref)

    print("KERNEL_OK")
</pallas_src>

<mosaic_0001>
module attributes {stable_mosaic.version = 11 : i64} {
  func.func @kernel(%arg0: i32, %arg1: i32, %arg2: memref<2x8x32xbf16, #tpu.memory_space<vmem>>, %arg3: memref<2x16x32xbf16, #tpu.memory_space<vmem>>, %arg4: memref<2x1x16xf32, #tpu.memory_space<vmem>>, %arg5: memref<2x128xf32, #tpu.memory_space<vmem>>, %arg6: memref<2x8x1xf32, #tpu.memory_space<vmem>>) attributes {dimension_semantics = [#tpu.dimension_semantics<parallel>, #tpu.dimension_semantics<arbitrary>], iteration_bounds = array<i64: 1, 1>, scalar_prefetch = 0 : i64, scratch_operands = 1 : i64, tpu.core_type = #tpu.core_type<tc>, window_params = [{transform_indices = @transform_0, window_bounds = array<i64: 2, 8, 32>}, {transform_indices = @transform_1, window_bounds = array<i64: 2, 16, 32>}, {transform_indices = @transform_2, window_bounds = array<i64: 2, 1, 16>}, {transform_indices = @transform_3, window_bounds = array<i64: 2, 128>}]} {
    %c0_i32 = arith.constant 0 : i32
    %0 = arith.cmpi eq, %arg1, %c0_i32 : i32
    %1 = arith.extui %0 : i1 to i32
    %c0_i32_0 = arith.constant 0 : i32
    %2 = arith.cmpi ne, %1, %c0_i32_0 : i32
    scf.if %2 {
      %cst_18 = arith.constant 0xFF800000 : f32
      %17 = vector.broadcast %cst_18 : f32 to vector<2x8x1xf32>
      %c0_19 = arith.constant 0 : index
      %c0_20 = arith.constant 0 : index
      %c0_21 = arith.constant 0 : index
      %18 = vector.load %arg6[%c0_19, %c0_20, %c0_21] : memref<2x8x1xf32, #tpu.memory_space<vmem>>, vector<2x8x1xf32>
      tpu.vector_store %arg6[%c0_19, %c0_20, %c0_21], %17 {strides = array<i32>} : memref<2x8x1xf32, #tpu.memory_space<vmem>>, vector<2x8x1xf32>,
    } else {
    }
    %c0 = arith.constant 0 : index
    %c0_1 = arith.constant 0 : index
    %c0_2 = arith.constant 0 : index
    %3 = vector.load %arg2[%c0, %c0_1, %c0_2] : memref<2x8x32xbf16, #tpu.memory_space<vmem>>, vector<2x8x32xbf16>
    %c0_3 = arith.constant 0 : index
    %c0_4 = arith.constant 0 : index
    %c0_5 = arith.constant 0 : index
    %4 = vector.load %arg3[%c0_3, %c0_4, %c0_5] : memref<2x16x32xbf16, #tpu.memory_space<vmem>>, vector<2x16x32xbf16>
    "tpu.trace_start"() <{level = 10 : i32, message = "bqd,bkd->bqk"}> : () -> ()
    %cst = arith.constant dense<0.000000e+00> : vector<2x8x16xf32>
    %5 = tpu.matmul %3, %4, %cst {dimension_numbers = #tpu.dot_dimension_numbers<[2], [2], [1], [1], [0, 0, 0, 1, 1, 1], [0], [0]>} : vector<2x8x32xbf16>, vector<2x16x32xbf16>, vector<2x8x16xf32> -> vector<2x8x16xf32>
    "tpu.trace_stop"() : () -> ()
    %c0_6 = arith.constant 0 : index
    %c0_7 = arith.constant 0 : index
    %c0_8 = arith.constant 0 : index
    %6 = vector.load %arg4[%c0_6, %c0_7, %c0_8] : memref<2x1x16xf32, #tpu.memory_space<vmem>>, vector<2x1x16xf32>
    %7 = vector.broadcast %6 : vector<2x1x16xf32> to vector<2x8x16xf32>
    %8 = arith.addf %5, %7 : vector<2x8x16xf32>
    %c0_9 = arith.constant 0 : index
    %c0_10 = arith.constant 0 : index
    %c0_11 = arith.constant 0 : index
    %9 = vector.load %arg6[%c0_9, %c0_10, %c0_11] : memref<2x8x1xf32, #tpu.memory_space<vmem>>, vector<2x8x1xf32>
    %cst_12 = arith.constant dense<0xFF800000> : vector<2x8xf32>
    %10 = vector.multi_reduction <maximumf>, %8, %cst_12 [2] : vector<2x8x16xf32> to vector<2x8xf32>
    %11 = vector.shape_cast %10 : vector<2x8xf32> to vector<2x8x1xf32>
    %12 = arith.maximumf %9, %11 : vector<2x8x1xf32>
    %c0_13 = arith.constant 0 : index
    %c0_14 = arith.constant 0 : index
    %c0_15 = arith.constant 0 : index
    %13 = vector.load %arg6[%c0_13, %c0_14, %c0_15] : memref<2x8x1xf32, #tpu.memory_space<vmem>>, vector<2x8x1xf32>
    tpu.vector_store %arg6[%c0_13, %c0_14, %c0_15], %12 {strides = array<i32>} : memref<2x8x1xf32, #tpu.memory_space<vmem>>, vector<2x8x1xf32>,
    %c0_i32_16 = arith.constant 0 : i32
    %14 = arith.cmpi eq, %arg1, %c0_i32_16 : i32
    %15 = arith.extui %14 : i1 to i32
    %c0_i32_17 = arith.constant 0 : i32
    %16 = arith.cmpi ne, %15, %c0_i32_17 : i32
    scf.if %16 {
      %c0_18 = arith.constant 0 : index
      %c0_19 = arith.constant 0 : index
      %c0_20 = arith.constant 0 : index
      %17 = vector.load %arg6[%c0_18, %c0_19, %c0_20] : memref<2x8x1xf32, #tpu.memory_space<vmem>>, vector<2x8x1xf32>
      %cst_21 = arith.constant dense<0.000000e+00> : vector<2x1xf32>
      %18 = vector.multi_reduction <add>, %17, %cst_21 [1] : vector<2x8x1xf32> to vector<2x1xf32>
      %19 = vector.shape_cast %18 : vector<2x1xf32> to vector<2x1xf32>
      %20 = vector.broadcast %19 : vector<2x1xf32> to vector<2x128xf32>
      %c0_22 = arith.constant 0 : index
      %c0_23 = arith.constant 0 : index
      %21 = vector.load %arg5[%c0_22, %c0_23] : memref<2x128xf32, #tpu.memory_space<vmem>>, vector<2x128xf32>
      tpu.vector_store %arg5[%c0_22, %c0_23], %20 {strides = array<i32>} : memref<2x128xf32, #tpu.memory_space<vmem>>, vector<2x128xf32>,
    } else {
    }
    return
  }
  func.func @transform_0(%arg0: i32, %arg1: i32) -> (i32, i32, i32) {
    %c0_i32 = arith.constant 0 : i32
    %c0_i32_0 = arith.constant 0 : i32
    %c0_i32_1 = arith.constant 0 : i32
    return %arg0, %c0_i32, %c0_i32_0 : i32, i32, i32
  }
  func.func @transform_1(%arg0: i32, %arg1: i32) -> (i32, i32, i32) {
    %c0_i32 = arith.constant 0 : i32
    %c0_i32_0 = arith.constant 0 : i32
    return %arg0, %arg1, %c0_i32 : i32, i32, i32
  }
  func.func @transform_2(%arg0: i32, %arg1: i32) -> (i32, i32, i32) {
    %c0_i32 = arith.constant 0 : i32
    %c0_i32_0 = arith.constant 0 : i32
    return %arg0, %c0_i32, %arg1 : i32, i32, i32
  }
  func.func @transform_3(%arg0: i32, %arg1: i32) -> (i32, i32) {
    %c0_i32 = arith.constant 0 : i32
    %c0_i32_0 = arith.constant 0 : i32
    return %arg0, %c0_i32 : i32, i32
  }
}

</mosaic_0001>

<bundles_post_ra>
// kernel: maxsim_score.1
= control target key start
LH: loop header
LB: loop body
LE: loop exit
PB: predicated region body
PF: predicated region fallthrough
CT: control target
= control target key end

     0   :  { %vm47_vm0 = vcmask 261120   ;;  %v224_v0 = vmov 0.0   ;;  %vm225_vm1 = vmmov 0   ;;  %vm19_vm2 = vcmask 7168   ;;  %s279_s1 = inlined_call_operand.vmem [shape: bf16[2,16,32], index: 1, kind: input, shape index: {}]   ;;  %s280_s0 = inlined_call_operand.vmem [shape: bf16[2,8,32], index: 0, kind: input, shape index: {}]   ;;  %s281_s2 = inlined_call_operand.vmem [shape: f32[2,1,16], index: 2, kind: input, shape index: {}]   ;;  %s282_s3 = inlined_call_operand.vmem [shape: f32[2,128], index: 3, kind: output, shape index: {}]  }
   0x1   :  { %204 = vmatprep.subr.bf16.mxu0 %v224_v0  ;;  %v222_v1 = vld [vmem:[%s279_s1] sm:$0xff]   ;;  %210 = vmatprep.subr.bf16.mxu1 %v224_v0  ;;  %v223_v2 = vld [vmem:[%s279_s1 + $0x8] sm:$0xff]   ;;  %v226_v7 = vmov -inf   ;;  %vm147_vm3 = vcmask 130048   ;;  %v227_v22 = vmov 0   ;;  %vm186_vm4 = vcmask 1041409  }
   0x2   :  { %206 = vmatprep.mubr.msk.bf16.mxu0 %vm225_vm1, %v224_v0  ;;  %212 = vmatprep.mubr.msk.bf16.mxu1 %vm225_vm1, %v224_v0  ;;  %v52_v3 = vsel %vm47_vm0, %v222_v1, 0  ;;  %v103_v4 = vsel %vm47_vm0, %v223_v2, 0  ;;  %v22_v5 = vld [vmem:[%s280_s0] sm:$0xf]  ;;  %v23_v6 = vld [vmem:[%s280_s0 + $0x4] sm:$0xf] }
   0x3   :  { %205 = vmatpush3.bf16.xpose.msra.mxu0 %v52_v3  ;;  %211 = vmatpush3.bf16.xpose.msra.mxu1 %v103_v4  ;;  %20 = vst.msk [vmem:[#allocation2] sm:$0xff] %vm19_vm2, %v226_v7  ;;  %21 = vst.msk [vmem:[#allocation2 + $0x8] sm:$0xff] %vm19_vm2, %v226_v7  ;;  %v194_v8 = vld [vmem:[%s281_s2] ss:$0 sm:$0xff]  ;;  %v195_v9 = vld [vmem:[%s281_s2 + $0x1] ss:$0 sm:$0xff] }
   0x4   :  { %220 = vset.pattern.permute.xlu1 %v227_v22  ;;  %221 = vset.pattern.permute.xlu0 %v227_v22 }
   0xa   :  { %207 = vmatmul.mubr.msk.bf16.vlgmr.msra.gmra.mrb[0].mxu0 %vm47_vm0, %v22_v5  ;;  %213 = vmatmul.mubr.msk.bf16.vlgmr.msra.gmra.mrb[0].mxu1 %vm47_vm0, %v23_v6  ;;  %v145_v23 = vld [vmem:[#allocation2] sm:$0xff]  ;;  %v146_v26 = vld [vmem:[#allocation2 + $0x8] sm:$0xff] }
  0xdd   :  { %v88_v10 = vpop.f32.mrb[0].mxu0  ;;  %v139_v13 = vpop.f32.mrb[0].mxu1 }
  0xde   :  { %v89_v11 = vadd.f32 %v194_v8, %v88_v10  ;;  %v208_v12 = vpop.f32.mrb[1].mxu0  ;;  %v140_v14 = vadd.f32 %v195_v9, %v139_v13  ;;  %v214_v16 = vpop.f32.mrb[1].mxu1 }
  0xdf   :  { %v91_v15 = vpop.f32.mrb[2].mxu0  ;;  %v142_v18 = vpop.f32.mrb[2].mxu1 }
  0xe0   :  { %v209_v17 = vpop.f32.mrb[3].mxu0  ;;  %v148_v19 = vsel %vm147_vm3, %v89_v11, -inf  ;;  %v215_v20 = vpop.f32.mrb[3].mxu1  ;;  %v151_v21 = vsel %vm147_vm3, %v140_v14, -inf }
  0xe1   :  { %149 = vmax.xlane.f32.xlu0 %v148_v19 }
  0xe5   :  { %152 = vmax.xlane.f32.xlu0 %v151_v21 }
 0x16e   :  { %v150_v24 = vpop.xlane.xlu0 %149 }
 0x16f   :  { %v154_v25 = vmax.f32 %v145_v23, %v150_v24 }
 0x171   :  { %157 = vst.msk [vmem:[#allocation2] sm:$0xff] %vm19_vm2, %v154_v25 }
 0x172   :  { %v153_v27 = vpop.xlane.xlu0 %152 }
 0x173   :  { %v155_v28 = vmax.f32 %v146_v26, %v153_v27 }
 0x175   :  { %158 = vst.msk [vmem:[#allocation2 + $0x8] sm:$0xff] %vm19_vm2, %v155_v28 }
 0x178   :  { %v162_v29 = vld [vmem:[#allocation2] sm:$0xff] }
 0x179   :  { %v164_v30 = vsel %vm19_vm2, %v162_v29, 0.0 }
 0x17a   :  { %v165_v31 = vrot.slane %v164_v30, 4 }
 0x17c   :  { %v166_v32 = vadd.f32 %v165_v31, %v164_v30  ;;  %v163_v33 = vld [vmem:[#allocation2 + $0x8] sm:$0xff] }
 0x17d   :  { %v171_v34 = vsel %vm19_vm2, %v163_v33, 0.0 }
 0x17e   :  { %v167_v35 = vrot.slane %v166_v32, 2  ;;  %v172_v36 = vrot.slane %v171_v34, 4 }
 0x180   :  { %v168_v37 = vadd.f32 %v167_v35, %v166_v32  ;;  %v173_v38 = vadd.f32 %v172_v36, %v171_v34 }
 0x182   :  { %v169_v39 = vrot.slane %v168_v37, 1  ;;  %v174_v40 = vrot.slane %v173_v38, 2 }
 0x184   :  { %v170_v41 = vadd.f32 %v169_v39, %v168_v37  ;;  %v175_v42 = vadd.f32 %v174_v40, %v173_v38 }
 0x186   :  { %180 = vperm.xlu1 %220, %v170_v41   ;;  %v176_v43 = vrot.slane %v175_v42, 1 }
 0x188   :  { %v177_v44 = vadd.f32 %v176_v43, %v175_v42 }
 0x18a   :  { %184 = vperm.xlu1 %220, %v177_v44  }
 0x205   :  { %v181_v45 = vpop.permute.xlu1 %180 }
 0x209   :  { %v185_v46 = vpop.permute.xlu1 %184 }
 0x20a   :  { %v187_v47 = vsel %vm186_vm4, %v185_v46, %v181_v45 }
 0x20b   :  { %189 = vst [vmem:[%s282_s3] sm:$0x3] %v187_v47 }

</bundles_post_ra>
